<compile_context>
chip_gen: v7x
topology: tpu7x:2x2x1
jax: 0.10.0
libtpu: 0.0.40
codegen_flags: <defaults>
</compile_context>

<pallas_src>
import functools

import jax
import jax.numpy as jnp
from jax.experimental import pallas as pl
from jax.experimental.pallas import tpu as pltpu


def _round_up(x, m):
    return -(-int(x) // m) * m


def _round_down(x, m):
    return (int(x) // m) * m


def _pow_modulator(one_minus_pt, gamma):
    """(1 - pt) ** gamma, NaN-safe, specialised for integer gamma."""
    g = float(gamma)
    if g == 0.0:
        return jnp.ones_like(one_minus_pt)
    if g.is_integer() and 0 < g <= 8:
        # gamma=2 (the default) becomes a single VPU multiply.
        n = int(g)
        result = one_minus_pt
        for _ in range(n - 1):
            result = result * one_minus_pt
        return result
    # Non-integer gamma: exp(g*log(x)) with clamping so x<=0 gives exactly 0.
    safe = jnp.maximum(one_minus_pt, jnp.float32(1e-30))
    return jnp.where(one_minus_pt > 0.0,
                     jnp.exp(jnp.float32(g) * jnp.log(safe)),
                     jnp.zeros_like(one_minus_pt))


def _focal_loss_kernel(pred_ref, tgt_ref, alpha_ref, out_ref, *,
                       gamma, num_classes, small_c, reduce_sum, mask_tail,
                       n_valid, tile_n):
    pred = pred_ref[...].astype(jnp.float32)                 # (C, TN)
    tgt = tgt_ref[...]                                        # (1, TN) int32

    # Numerically stable softmax pieces over the class (sublane) axis.
    m = jnp.max(pred, axis=0, keepdims=True)                  # (1, TN)
    shifted = pred - m                                         # (C, TN)
    exp_shifted = jnp.exp(shifted)                             # (C, TN)  EUP
    sum_exp = jnp.sum(exp_shifted, axis=0, keepdims=True)      # (1, TN)

    # Target-class "gather" via a bool mask + select + sublane reduce.
    # log_softmax is never materialised.
    class_ids = jax.lax.broadcasted_iota(jnp.int32, pred.shape, 0)
    mask = class_ids == tgt                                    # (C, TN) bool
    shifted_t = jnp.sum(jnp.where(mask, shifted, 0.0), axis=0, keepdims=True)
    exp_t = jnp.sum(jnp.where(mask, exp_shifted, 0.0), axis=0, keepdims=True)

    logpt = shifted_t - jnp.log(sum_exp)                       # (1, TN)
    ce_loss = -logpt
    # pt from the already-computed exponentials; approx reciprocal lowers to
    # the EUP (non-binding slot) and breaks the exp->log->exp serial chain.
    pt = exp_t * pl.reciprocal(sum_exp, approx=True)
    one_minus_pt = jnp.maximum(1.0 - pt, 0.0)                  # no NaN from pow
    modulator = _pow_modulator(one_minus_pt, gamma)

    if small_c:
        # Per-class scalar alpha from SMEM via a short select chain on the
        # (1, TN) row -- no (C, TN) broadcast / reduce.
        alpha_t = jnp.zeros(tgt.shape, jnp.float32)
        for c in range(num_classes):
            alpha_t = jnp.where(tgt == c, alpha_ref[c], alpha_t)
    else:
        alpha_vec = alpha_ref[...].astype(jnp.float32)         # (C, 1)
        alpha_t = jnp.sum(jnp.where(mask, alpha_vec, 0.0), axis=0, keepdims=True)

    loss = alpha_t * modulator * ce_loss                        # (1, TN)

    if not reduce_sum:
        out_ref[...] = loss.astype(out_ref.dtype)
    else:
        if mask_tail:
            # pred's ragged tail block contains garbage lanes: mask them out
            # before they can poison the sum.
            col = (pl.program_id(0) * tile_n
                   + jax.lax.broadcasted_iota(jnp.int32, loss.shape, 1))
            loss = jnp.where(col < n_valid, loss, 0.0)
        tile_sum = jnp.sum(loss)

        @pl.when(pl.program_id(0) == 0)
        def _():
            out_ref[...] = jnp.zeros_like(out_ref)

        out_ref[...] += tile_sum


def multiclass_focal_loss(pred, target, alpha, *, gamma=2.0, reduction="none",
                          max_tile_n=32768, pred_layout="nc"):
    """pred: (N, C) logits (or (C, N) with pred_layout='cn'); target: (N,) ints;
    alpha: (C,) per-class weights."""
    if pred_layout == "nc":
        N, C = pred.shape
        # One XLA transpose; pass pred_layout="cn" with pred already (C, N)
        # (e.g. by swapping the operand order of the producing matmul) to
        # avoid this extra HBM pass entirely.
        pred_t = jnp.transpose(pred)
    elif pred_layout == "cn":
        C, N = pred.shape
        pred_t = pred
    else:
        raise ValueError(f"unknown pred_layout: {pred_layout!r}")

    reduce_sum = reduction in ("mean", "sum")
    c_pad = _round_up(C, 8)
    pred_itemsize = jnp.dtype(pred.dtype).itemsize

    # Conservative per-lane VMEM working-set estimate: double-buffered blocks
    # plus worst-case live Mosaic temporaries (full-height (C,TN) values and
    # (1,TN) rows, all assumed 8-sublane padded f32).
    bytes_per_lane = (2 * c_pad * pred_itemsize            # pred blocks
                      + 2 * 8 * 4                          # target blocks (i32)
                      + (0 if reduce_sum else 2 * 8 * 4)   # per-sample out blocks
                      + 6 * c_pad * 4                      # (C, TN) f32 temps
                      + 12 * 8 * 4)                        # (1, TN) row temps
    vmem_budget = 24 * 1024 * 1024                          # < 32 MiB scoped limit
    budget_tile = max(128, _round_down(vmem_budget // bytes_per_lane, 128))

    tile_n = min(int(max_tile_n), budget_tile, _round_up(max(N, 1), 128))
    tile_n = max(128, _round_down(tile_n, 128))
    if not reduce_sum and N > 128:
        # v7x megacore: make the "parallel" grid at least 2 steps.
        tile_n = min(tile_n, max(128, _round_up(-(-N // 2), 128)))

    n_tiles = pl.cdiv(N, tile_n)
    n_pad = n_tiles * tile_n

    # Only the tiny int32 target is padded; pred's tail is handled as a ragged
    # Pallas edge block (garbage lanes are masked / sliced off).
    target_i = target.astype(jnp.int32)
    if n_pad != N:
        target_i = jnp.pad(target_i, (0, n_pad - N))
    tgt2d = target_i.reshape(1, n_pad)

    small_c = C <= 16
    if small_c:
        alpha_arg = jnp.asarray(alpha, dtype=jnp.float32).reshape(C)
        alpha_spec = pl.BlockSpec(memory_space=pltpu.MemorySpace.SMEM)
    else:
        alpha_arg = jnp.asarray(alpha, dtype=jnp.float32).reshape(C, 1)
        alpha_spec = pl.BlockSpec((C, 1), lambda i: (0, 0))

    kernel = functools.partial(
        _focal_loss_kernel, gamma=float(gamma), num_classes=C, small_c=small_c,
        reduce_sum=reduce_sum, mask_tail=(n_pad != N), n_valid=N, tile_n=tile_n)

    if reduce_sum:
        out_shape = jax.ShapeDtypeStruct((1, 1), jnp.float32)
        out_spec = pl.BlockSpec((1, 1), lambda i: (0, 0))     # resident accumulator
        semantics = ("arbitrary",)
    else:
        out_shape = jax.ShapeDtypeStruct((1, n_pad), jnp.float32)
        out_spec = pl.BlockSpec((1, tile_n), lambda i: (0, i))
        semantics = ("parallel",)

    out = pl.pallas_call(
        kernel,
        out_shape=out_shape,
        grid_spec=pltpu.PrefetchScalarGridSpec(
            num_scalar_prefetch=0,
            grid=(n_tiles,),
            in_specs=[
                pl.BlockSpec((C, tile_n), lambda i: (0, i)),   # pred (ragged tail OK)
                pl.BlockSpec((1, tile_n), lambda i: (0, i)),   # target
                alpha_spec,                                    # alpha
            ],
            out_specs=out_spec,
        ),
        compiler_params=pltpu.CompilerParams(
            dimension_semantics=semantics,
            # Explicit scoped-VMEM limit: safe on v5e (128 MiB phys, 16 MiB
            # default), v6e (128 MiB phys) and v7x (64 MiB phys).
            vmem_limit_bytes=32 * 1024 * 1024),
    )(pred_t, tgt2d, alpha_arg)

    if reduction == "mean":
        return out[0, 0] / jnp.float32(N)
    if reduction == "sum":
        return out[0, 0]
    return out.reshape(n_pad)[:N]


def _reference(pred, target, alpha, gamma=2.0):
    # Pure-JAX reference mirroring the PyTorch forward.
    log_sm = jax.nn.log_softmax(pred.astype(jnp.float32), axis=1)
    logpt = jnp.take_along_axis(log_sm, target.reshape(-1, 1), axis=1).reshape(-1)
    ce = -logpt
    pt = jnp.exp(logpt)
    alpha_t = jnp.asarray(alpha, dtype=jnp.float32)[target]
    return alpha_t * (1.0 - pt) ** gamma * ce


if __name__ == "__main__":
    key = jax.random.PRNGKey(0)
    # 3-class example from the module docstring; N deliberately not a multiple
    # of 128 to exercise the ragged-tail path.
    N, C = 50, 3
    alpha = jnp.array([0.2, 0.3, 0.5], dtype=jnp.float32)
    gamma = 2.0

    k_pred, k_tgt = jax.random.split(key)
    pred = jax.random.normal(k_pred, (N, C), dtype=jnp.float32)
    target = jax.random.randint(k_tgt, (N,), 0, C, dtype=jnp.int32)
    ref = _reference(pred, target, alpha, gamma=gamma)

    # Tolerances are slightly relaxed because pt uses the approximate EUP
    # reciprocal inside the kernel.
    out = jax.block_until_ready(
        multiclass_focal_loss(pred, target, alpha, gamma=gamma, reduction="none"))
    assert out.shape == (N,)
    assert jnp.allclose(out, ref, atol=2e-3, rtol=2e-3), (out, ref)

    # Pre-transposed pred path (avoids the wrapper-side HBM transpose).
    out_cn = jax.block_until_ready(
        multiclass_focal_loss(pred.T, target, alpha, gamma=gamma,
                              reduction="none", pred_layout="cn"))
    assert jnp.allclose(out_cn, ref, atol=2e-3, rtol=2e-3)

    # Fused in-kernel reductions.
    out_mean = jax.block_until_ready(
        multiclass_focal_loss(pred, target, alpha, gamma=gamma, reduction="mean"))
    out_sum = jax.block_until_ready(
        multiclass_focal_loss(pred, target, alpha, gamma=gamma, reduction="sum"))
    assert jnp.allclose(out_mean, jnp.mean(ref), atol=2e-3, rtol=2e-3)
    assert jnp.allclose(out_sum, jnp.sum(ref), atol=1e-2, rtol=5e-3)

    # Multi-tile grid with a ragged tail: exercises edge blocks, the
    # "parallel" per-sample path and the "arbitrary" accumulator path.
    N2 = 300
    pred2 = jax.random.normal(jax.random.PRNGKey(1), (N2, C), dtype=jnp.float32)
    target2 = jax.random.randint(jax.random.PRNGKey(2), (N2,), 0, C, dtype=jnp.int32)
    ref2 = _reference(pred2, target2, alpha, gamma=gamma)
    out2 = jax.block_until_ready(
        multiclass_focal_loss(pred2, target2, alpha, gamma=gamma,
                              reduction="none", max_tile_n=128))
    assert jnp.allclose(out2, ref2, atol=2e-3, rtol=2e-3)
    sum2 = jax.block_until_ready(
        multiclass_focal_loss(pred2, target2, alpha, gamma=gamma,
                              reduction="sum", max_tile_n=128))
    assert jnp.allclose(sum2, jnp.sum(ref2), atol=5e-2, rtol=5e-3)

    print("KERNEL_OK")
</pallas_src>

<mosaic_0001>
module attributes {stable_mosaic.version = 11 : i64} {
  func.func @_focal_loss_kernel(%arg0: i32, %arg1: memref<3x128xf32, #tpu.memory_space<vmem>>, %arg2: memref<1x128xi32, #tpu.memory_space<vmem>>, %arg3: memref<3xf32, #tpu.memory_space<smem>>, %arg4: memref<1x128xf32, #tpu.memory_space<vmem>>) attributes {dimension_semantics = [#tpu.dimension_semantics<parallel>], iteration_bounds = array<i64: 1>, scalar_prefetch = 0 : i64, scratch_operands = 0 : i64, tpu.core_type = #tpu.core_type<tc>, window_params = [{transform_indices = @transform_0, window_bounds = array<i64: 3, 128>}, {transform_indices = @transform_1, window_bounds = array<i64: 1, 128>}, {transform_indices = @transform_2, window_bounds = array<i64: 3>}, {transform_indices = @transform_3, window_bounds = array<i64: 1, 128>}]} {
    %c0 = arith.constant 0 : index
    %c0_0 = arith.constant 0 : index
    %0 = vector.load %arg1[%c0, %c0_0] : memref<3x128xf32, #tpu.memory_space<vmem>>, vector<3x128xf32>
    %c0_1 = arith.constant 0 : index
    %c0_2 = arith.constant 0 : index
    %1 = vector.load %arg2[%c0_1, %c0_2] : memref<1x128xi32, #tpu.memory_space<vmem>>, vector<1x128xi32>
    %cst = arith.constant dense<0xFF800000> : vector<128xf32>
    %2 = vector.multi_reduction <maximumf>, %0, %cst [0] : vector<3x128xf32> to vector<128xf32>
    %3 = vector.shape_cast %2 : vector<128xf32> to vector<1x128xf32>
    %4 = vector.broadcast %3 : vector<1x128xf32> to vector<3x128xf32>
    %5 = arith.subf %0, %4 : vector<3x128xf32>
    %6 = math.exp %5 : vector<3x128xf32>
    %cst_3 = arith.constant dense<0.000000e+00> : vector<128xf32>
    %7 = vector.multi_reduction <add>, %6, %cst_3 [0] : vector<3x128xf32> to vector<128xf32>
    %8 = vector.shape_cast %7 : vector<128xf32> to vector<1x128xf32>
    %9 = tpu.iota {dimensions = array<i32: 0>} : vector<3x128xi32>
    %10 = vector.broadcast %1 : vector<1x128xi32> to vector<3x128xi32>
    %11 = arith.cmpi eq, %9, %10 : vector<3x128xi32>
    %cst_4 = arith.constant 0.000000e+00 : f32
    %12 = vector.broadcast %cst_4 : f32 to vector<3x128xf32>
    %13 = arith.select %11, %5, %12 : vector<3x128xi1>, vector<3x128xf32>
    %cst_5 = arith.constant dense<0.000000e+00> : vector<128xf32>
    %14 = vector.multi_reduction <add>, %13, %cst_5 [0] : vector<3x128xf32> to vector<128xf32>
    %15 = vector.shape_cast %14 : vector<128xf32> to vector<1x128xf32>
    %cst_6 = arith.constant 0.000000e+00 : f32
    %16 = vector.broadcast %cst_6 : f32 to vector<3x128xf32>
    %17 = arith.select %11, %6, %16 : vector<3x128xi1>, vector<3x128xf32>
    %cst_7 = arith.constant dense<0.000000e+00> : vector<128xf32>
    %18 = vector.multi_reduction <add>, %17, %cst_7 [0] : vector<3x128xf32> to vector<128xf32>
    %19 = vector.shape_cast %18 : vector<128xf32> to vector<1x128xf32>
    %20 = math.log %8 : vector<1x128xf32>
    %21 = arith.subf %15, %20 : vector<1x128xf32>
    %cst_8 = arith.constant 0.000000e+00 : f32
    %22 = vector.broadcast %cst_8 : f32 to vector<1x128xf32>
    %23 = arith.subf %22, %21 : vector<1x128xf32>
    %24 = tpu.reciprocal %8 {approx = true} : vector<1x128xf32> -> vector<1x128xf32>
    %25 = arith.mulf %19, %24 : vector<1x128xf32>
    %cst_9 = arith.constant 1.000000e+00 : f32
    %26 = vector.broadcast %cst_9 : f32 to vector<1x128xf32>
    %27 = arith.subf %26, %25 : vector<1x128xf32>
    %cst_10 = arith.constant 0.000000e+00 : f32
    %28 = vector.broadcast %cst_10 : f32 to vector<1x128xf32>
    %29 = arith.maximumf %27, %28 : vector<1x128xf32>
    %30 = arith.mulf %29, %29 : vector<1x128xf32>
    %cst_11 = arith.constant 0.000000e+00 : f32
    %31 = vector.broadcast %cst_11 : f32 to vector<1x128xf32>
    %c0_i32 = arith.constant 0 : i32
    %32 = vector.broadcast %c0_i32 : i32 to vector<1x128xi32>
    %33 = arith.cmpi eq, %1, %32 : vector<1x128xi32>
    %c0_12 = arith.constant 0 : index
    %34 = memref.load %arg3[%c0_12] : memref<3xf32, #tpu.memory_space<smem>>
    %35 = vector.broadcast %34 : f32 to vector<1x128xf32>
    %36 = arith.select %33, %35, %31 : vector<1x128xi1>, vector<1x128xf32>
    %c1_i32 = arith.constant 1 : i32
    %37 = vector.broadcast %c1_i32 : i32 to vector<1x128xi32>
    %38 = arith.cmpi eq, %1, %37 : vector<1x128xi32>
    %c1 = arith.constant 1 : index
    %39 = memref.load %arg3[%c1] : memref<3xf32, #tpu.memory_space<smem>>
    %40 = vector.broadcast %39 : f32 to vector<1x128xf32>
    %41 = arith.select %38, %40, %36 : vector<1x128xi1>, vector<1x128xf32>
    %c2_i32 = arith.constant 2 : i32
    %42 = vector.broadcast %c2_i32 : i32 to vector<1x128xi32>
    %43 = arith.cmpi eq, %1, %42 : vector<1x128xi32>
    %c2 = arith.constant 2 : index
    %44 = memref.load %arg3[%c2] : memref<3xf32, #tpu.memory_space<smem>>
    %45 = vector.broadcast %44 : f32 to vector<1x128xf32>
    %46 = arith.select %43, %45, %41 : vector<1x128xi1>, vector<1x128xf32>
    %47 = arith.mulf %46, %30 : vector<1x128xf32>
    %48 = arith.mulf %47, %23 : vector<1x128xf32>
    %c0_13 = arith.constant 0 : index
    %c0_14 = arith.constant 0 : index
    %49 = vector.load %arg4[%c0_13, %c0_14] : memref<1x128xf32, #tpu.memory_space<vmem>>, vector<1x128xf32>
    tpu.vector_store %arg4[%c0_13, %c0_14], %48 {strides = array<i32>} : memref<1x128xf32, #tpu.memory_space<vmem>>, vector<1x128xf32>,
    return
  }
  func.func @transform_0(%arg0: i32) -> (i32, i32) {
    %c0_i32 = arith.constant 0 : i32
    %c0_i32_0 = arith.constant 0 : i32
    return %c0_i32, %arg0 : i32, i32
  }
  func.func @transform_1(%arg0: i32) -> (i32, i32) {
    %c0_i32 = arith.constant 0 : i32
    %c0_i32_0 = arith.constant 0 : i32
    return %c0_i32, %arg0 : i32, i32
  }
  func.func @transform_2(%arg0: i32) -> i32 {
    %c0_i32 = arith.constant 0 : i32
    %c0_i32_0 = arith.constant 0 : i32
    return %c0_i32 : i32
  }
  func.func @transform_3(%arg0: i32) -> (i32, i32) {
    %c0_i32 = arith.constant 0 : i32
    %c0_i32_0 = arith.constant 0 : i32
    return %c0_i32, %arg0 : i32, i32
  }
}

</mosaic_0001>

<bundles_post_ra>
// kernel: tpu_custom_call.1
= control target key start
LH: loop header
LB: loop body
LE: loop exit
PB: predicated region body
PF: predicated region fallthrough
CT: control target
= control target key end

     0   :  { %8 = vsyncpa [#allocation3], 0  ;;  %s253_s0 = inlined_call_operand.hbm [shape: f32[3,50], index: 0, kind: input, shape index: {}]   ;;  %s254_s1 = inlined_call_operand.vmem [shape: s32[1,128], index: 1, kind: input, shape index: {}]   ;;  %s255_s2 = inlined_call_operand.vmem [shape: f32[3], index: 2, kind: input, shape index: {}]   ;;  %s256_s3 = inlined_call_operand.hbm [shape: f32[1,128], index: 3, kind: output, shape index: {}]  }
   0x1   :  { %9 = vsyncpa [#allocation5], 0 }
   0x2   :  { %10 = vsyncpa [#allocation4], 0  ;;  %s29_s14 = sshll.u32 %s255_s2, 4  ;;  %s196_s15 = smov [#allocation2]   ;;  %s30_s14 = int_to_ptr.vmem [resolvable:$true] %s29_s14 }
   0x3   :  { %s17_s16 = sshll.u32 %s196_s15, 4  ;;  %s134_s19 = scalar_lea.hbm %s253_s0, 64  ;;  %s18_s16 = int_to_ptr.vmem [resolvable:$true] %s17_s16 }
   0x4   :  { %p135_p0 = scmp.ne.s32.totalorder %s253_s0, %s134_s19  ;;  %p138_p1 = scmp.lt.u32.totalorder %s134_s19, %s253_s0 }
   0x6   :  { %p140_p2 = pnand %p138_p1, %p135_p0 }
   0x8   :  { %143 = shalt.err (!%p140_p2)
}
   0x9   :  { %s144_s24 = scalar_lea.vmem %s18_s16, 64  ;;  %p149_p4 = scmp.lt.s32.totalorder %s18_s16, %s18_s16 }
   0xa   :  { %p145_p3 = scmp.ne.s32.totalorder %s18_s16, %s144_s24  ;;  %p150_p5 = scmp.lt.s32.totalorder %s144_s24, %s144_s24 }
   0xc   :  { %p151_p6 = por %p150_p5, %p149_p4 }
   0xe   :  { %p152_p7 = pnand %p151_p6, %p145_p3 }
  0x10   :  { %155 = shalt.err (!%p152_p7)
}
  0x11   :  { %20 = dma.hbm_to_vmem [thread:$0]  %s253_s0, 64, %s18_s16, [#allocation3]  }
  0x12   :  { %s156_s26 = scalar_lea.vmem %s30_s14, 16  ;;  %p161_p9 = scmp.lt.s32.totalorder %s30_s14, %s30_s14 }
  0x13   :  { %p157_p8 = scmp.ne.s32.totalorder %s30_s14, %s156_s26  ;;  %p162_p10 = scmp.lt.s32.totalorder %s156_s26, %s156_s26 }
  0x15   :  { %p163_p11 = por %p162_p10, %p161_p9 }
  0x17   :  { %p164_p12 = pnand %p163_p11, %p157_p8 }
  0x19   :  { %167 = shalt.err (!%p164_p12)
}
  0x1a   :  { %s197_s27 = smov [#allocation6]  }
  0x1b   :  { %32 = dma.vmem_to_smem %s30_s14, 16, %s197_s27, [#allocation5]  }
  0x1c   :  { %190 = dma.done.wait [#allocation3], 64  }
  0x1d   :  { %191 = vsyncadd [#allocation3], 4294967232 }
  0x1e   :  { %192 = dma.done.wait [#allocation5], 16  }
  0x1f   :  { %193 = vsyncadd [#allocation5], 4294967280 }
  0x20   :  { %39 = sfence }
  0x21   :  { %v40_v0 = vld [vmem:[#allocation2] sm:$0x7]  ;;  %vm42_vm0 = vcmask 1042432   ;;  %v60_v6 = vlaneseq  ;;  %s123_s29 = sld [smem:[#allocation6 + $0x1]]  ;;  %s124_s30 = sld [smem:[#allocation6 + $0x2]] }
  0x22   :  { %v43_v1 = vsel %vm42_vm0, %v40_v0, -inf  ;;  %v41_v13 = vld [vmem:[%s254_s1] sm:$0x1]  ;;  %s93_s1 = sld [smem:[#allocation6]]  ;;  %s198_s4 = smov [#allocation7]  }
  0x23   :  { %v44_v2 = vrot.slane %v43_v1, 4  ;;  %v61_v9 = vshrl.u32 %v60_v6, 7  ;;  %vm92_vm2 = vcmp.eq.s32.totalorder %v41_v13, 0  ;;  %vm96_vm3 = vcmp.eq.s32.totalorder %v41_v13, 1  ;;  %s113_s5 = sshll.u32 %s198_s4, 4  ;;  %s114_s5 = int_to_ptr.vmem [resolvable:$true] %s113_s5 }
  0x24   :  { %vm100_vm4 = vcmp.eq.s32.totalorder %v41_v13, 2  ;;  %s168_s6 = scalar_lea.vmem %s114_s5, 16  ;;  %s172_s7 = scalar_lea.vmem %s114_s5, 32 }
  0x25   :  { %v45_v3 = vmax.f32 %v43_v1, %v44_v2  ;;  %v64_v12 = vsub.s32 0, %v61_v9  ;;  %p169_p13 = scmp.ne.s32.totalorder %s114_s5, %s168_s6  ;;  %p173_p0 = scmp.lt.s32.totalorder %s114_s5, %s114_s5 }
  0x26   :  { %p174_p1 = scmp.lt.s32.totalorder %s172_s7, %s168_s6 }
  0x27   :  { %v46_v4 = vrot.slane %v45_v3, 2  ;;  %v65_v14 = vrot.slane %v41_v13, %v64_v12  ;;  %v98_v44 = vstv %s123_s29  ;;  %v102_v49 = vstv %s124_s30 }
  0x28   :  { %v94_v38 = vstv %s93_s1  ;;  %p175_p2 = por %p174_p1, %p173_p0 }
  0x29   :  { %v47_v5 = vmax.f32 %v45_v3, %v46_v4  ;;  %vm66_vm1 = vcmp.eq.s32.totalorder %v61_v9, %v65_v14  ;;  %v95_v43 = vsel %vm92_vm2, %v94_v38, 0.0 }
  0x2a   :  { %v99_v48 = vsel %vm96_vm3, %v98_v44, %v95_v43  ;;  %p176_p3 = pnand %p175_p2, %p169_p13 }
  0x2b   :  { %v48_v7 = vrot.slane %v47_v5, 1  ;;  %v103_v51 = vsel %vm100_vm4, %v102_v49, %v99_v48 }
  0x2d   :  { %v49_v8 = vmax.f32 %v47_v5, %v48_v7 }
  0x2f   :  { %v50_v10 = vsub.f32 %v40_v0, %v49_v8 }
  0x31   :  { %v51_v11 = vmul.f32 1.442695, %v50_v10  ;;  %v67_v15 = vsel %vm66_vm1, %v50_v10, 0.0 }
  0x32   :  { %v68_v18 = vsel %vm42_vm0, %v67_v15, 0.0 }
  0x33   :  { %128 = vpow2.f32 %v51_v11  ;;  %v69_v24 = vrot.slane %v68_v18, 4 }
  0x35   :  { %v70_v28 = vadd.f32 %v69_v24, %v68_v18 }
  0x37   :  { %v71_v32 = vrot.slane %v70_v28, 2 }
  0x39   :  { %v72_v34 = vadd.f32 %v71_v32, %v70_v28 }
  0x3b   :  { %v73_v36 = vrot.slane %v72_v34, 1 }
  0x3d   :  { %v129_v16 = vpop.eup %128  ;;  %v74_v40 = vadd.f32 %v73_v36, %v72_v34 }
  0x3e   :  { %v53_v17 = vsel %vm42_vm0, %v129_v16, 0.0  ;;  %v75_v19 = vsel %vm66_vm1, %v129_v16, 0.0 }
  0x3f   :  { %v54_v20 = vrot.slane %v53_v17, 4  ;;  %v76_v21 = vsel %vm42_vm0, %v75_v19, 0.0 }
  0x40   :  { %v77_v22 = vrot.slane %v76_v21, 4 }
  0x41   :  { %v55_v23 = vadd.f32 %v54_v20, %v53_v17 }
  0x42   :  { %v78_v26 = vadd.f32 %v77_v22, %v76_v21 }
  0x43   :  { %v56_v25 = vrot.slane %v55_v23, 2 }
  0x44   :  { %v79_v30 = vrot.slane %v78_v26, 2 }
  0x45   :  { %v57_v27 = vadd.f32 %v56_v25, %v55_v23 }
  0x46   :  { %v80_v33 = vadd.f32 %v79_v30, %v78_v26 }
  0x47   :  { %v58_v29 = vrot.slane %v57_v27, 1 }
  0x48   :  { %v81_v35 = vrot.slane %v80_v33, 1 }
  0x49   :  { %v59_v31 = vadd.f32 %v58_v29, %v57_v27 }
  0x4a   :  { %v82_v37 = vadd.f32 %v81_v35, %v80_v33 }
  0x4b   :  { %130 = vlog2.f32 %v59_v31 }
  0x4c   :  { %132 = vrcp.f32 %v59_v31 }
  0x55   :  { %v131_v39 = vpop.eup %130 }
  0x56   :  { %v133_v41 = vpop.eup %132  ;;  %v84_v42 = vmul.f32 0.6931472, %v131_v39 }
  0x57   :  { %v88_v45 = vmul.f32 %v133_v41, %v82_v37 }
  0x58   :  { %v85_v46 = vsub.f32 %v74_v40, %v84_v42 }
  0x59   :  { %v89_v47 = vsub.f32 1.0, %v88_v45 }
  0x5a   :  { %v86_v52 = vsub.f32 0.0, %v85_v46 }
  0x5b   :  { %v90_v50 = vmax.f32 %v89_v47, 0.0 }
  0x5d   :  { %v91_v53 = vmul.f32 %v90_v50, %v90_v50 }
  0x5f   :  { %v104_v54 = vmul.f32 %v103_v51, %v91_v53 }
  0x61   :  { %v105_v55 = vmul.f32 %v104_v54, %v86_v52 }
  0x63   :  { %106 = vst [vmem:[#allocation7] sm:$0x1] %v105_v55 }
  0x64   :  { %179 = shalt.err (!%p176_p3)
}
  0x65   :  { %s180_s10 = scalar_lea.hbm %s256_s3, 16 }
  0x66   :  { %p181_p4 = scmp.ne.s32.totalorder %s256_s3, %s180_s10  ;;  %p184_p5 = scmp.lt.u32.totalorder %s180_s10, %s256_s3 }
  0x68   :  { %p186_p6 = pnand %p184_p5, %p181_p4 }
  0x6a   :  { %189 = shalt.err (!%p186_p6)
}
  0x6b   :  { %116 = dma.vmem_to_hbm [thread:$0]  %s114_s5, 16, %s256_s3, [#allocation4]  }
  0x6c   :  { %194 = dma.done.wait [#allocation4], 16  }
  0x6d   :  { %195 = vsyncadd [#allocation4], 4294967280 }
  0x6e   :  { %120 = vsyncpa [#allocation3], 1 }
  0x6f   :  { %121 = vsyncpa [#allocation4], 1 }
  0x70   :  { %122 = vsyncpa [#allocation5], 1 }

</bundles_post_ra>
